<compile_context>
chip_gen: v6e
topology: v6e:2x2x1
jax: 0.10.0
libtpu: 0.0.40
codegen_flags: <defaults>
</compile_context>

<pallas_src>
import math

import jax
import jax.numpy as jnp
from jax.experimental import pallas as pl
from jax.experimental.pallas import tpu as pltpu

_LANES = 128
_SUBLANES = 8
_MAX_BLOCK_ROWS = 4096               # 2 MiB f32 block
_MIN_BLOCK_ROWS = 256
_ACC_ROWS = 256                      # fixed accumulator height
_INPUT_VMEM_TARGET = 16 * 1024 * 1024  # double-buffered input byte budget
_VMEM_LIMIT = 32 * 1024 * 1024       # safe on v5e/v6e/v7x


# ------------------------------ slab helpers ------------------------------- #

def _padded_rows(n_elems):
    """Rows of the (rows, 128) slab after padding n_elems to an (8,128) tile."""
    return pl.cdiv(n_elems, _SUBLANES * _LANES) * _SUBLANES


def _as_slab(x, pad_value):
    """Flatten x to (rows, 128) in its native dtype.

    Only tensors whose element count is not a multiple of 1024 pay a padded
    copy (tail filled with the neutral pad_value); aligned tensors are just
    reshaped (no extra HBM traffic).
    """
    flat = x.reshape(-1)
    n = flat.shape[0]
    rows = _padded_rows(n)
    total = rows * _LANES
    if total != n:
        # TODO(synk): for large misaligned tensors this concatenate is an
        # extra HBM round-trip; production shapes should be 1024-aligned (or
        # have a 128-multiple trailing dim) so this path never triggers.
        pad = jnp.full((total - n,), pad_value, dtype=flat.dtype)
        flat = jnp.concatenate([flat, pad])
    return flat.reshape(rows, _LANES)


def _pick_block_rows(n_slabs, max_rows):
    """Largest block (multiple of _ACC_ROWS) fitting the input VMEM budget."""
    per_row_bytes = 2 * _LANES * 4           # double-buffered f32 row
    cap = _INPUT_VMEM_TARGET // max(1, n_slabs * per_row_bytes)
    cap = (min(cap, _MAX_BLOCK_ROWS) // _ACC_ROWS) * _ACC_ROWS
    cap = max(cap, _MIN_BLOCK_ROWS)
    if max_rows <= cap:
        return max_rows                       # everything fits in one block
    return cap


class _Slab:
    """Static per-input tiling metadata."""

    def __init__(self, rows, block_rows):
        self.rows = rows
        self.tiled = rows > block_rows
        if self.tiled:
            self.full_blocks = rows // block_rows
            self.edge_rows = rows - self.full_blocks * block_rows
            self.n_blocks = self.full_blocks + (1 if self.edge_rows else 0)
        else:
            self.full_blocks = 1
            self.edge_rows = 0
            self.n_blocks = 1


def _fold(vals, rows_out):
    """Fold (rows_in, 128) -> (rows_out, 128) by summing sublane groups."""
    rows_in, lanes = vals.shape
    if rows_in == rows_out:
        return vals
    return jnp.sum(vals.reshape(rows_in // rows_out, rows_out, lanes), axis=0)


# ------------------------------ fused kernel ------------------------------- #

def _make_kernel(lik_meta, sse_meta, block_rows, acc_rows, steps_per_core):
    n_lik = len(lik_meta)

    def _log_contrib(ref, meta, blk, acc_ref, first_step):
        if meta.tiled:
            @pl.when(blk < meta.full_blocks)          # interior: unmasked
            def _():
                vals = jnp.log(ref[...].astype(jnp.float32))
                acc_ref[...] += _fold(vals, acc_rows)

            if meta.edge_rows:                        # one masked edge block
                @pl.when(blk == meta.full_blocks)
                def _():
                    rid = jax.lax.broadcasted_iota(
                        jnp.int32, (block_rows, _LANES), 0)
                    x = jnp.where(rid < meta.edge_rows,
                                  ref[...].astype(jnp.float32), 1.0)
                    acc_ref[...] += _fold(jnp.log(x), acc_rows)
        else:                                         # whole slab, done once
            @pl.when(first_step)
            def _():
                vals = jnp.log(ref[...].astype(jnp.float32))
                acc_ref[0:_SUBLANES, :] += _fold(vals, _SUBLANES)

    def _sse_contrib(a_ref, b_ref, meta, blk, acc_ref, first_step):
        if meta.tiled:
            @pl.when(blk < meta.full_blocks)
            def _():
                d = (a_ref[...].astype(jnp.float32)
                     - b_ref[...].astype(jnp.float32))
                acc_ref[...] += _fold(d * d, acc_rows)

            if meta.edge_rows:
                @pl.when(blk == meta.full_blocks)
                def _():
                    rid = jax.lax.broadcasted_iota(
                        jnp.int32, (block_rows, _LANES), 0)
                    d = (a_ref[...].astype(jnp.float32)
                         - b_ref[...].astype(jnp.float32))
                    acc_ref[...] += _fold(
                        jnp.where(rid < meta.edge_rows, d * d, 0.0), acc_rows)
        else:
            @pl.when(first_step)
            def _():
                d = (a_ref[...].astype(jnp.float32)
                     - b_ref[...].astype(jnp.float32))
                acc_ref[0:_SUBLANES, :] += _fold(d * d, _SUBLANES)

    def kernel(*refs):
        lik_refs = refs[:n_lik]
        a_ref = refs[n_lik]            # x_hat slab
        b_ref = refs[n_lik + 1]        # target slab
        log_out = refs[n_lik + 2]      # (1, 8, 128) per-core partial
        sse_out = refs[n_lik + 3]      # (1, 8, 128) per-core partial
        log_acc = refs[n_lik + 4]      # VMEM (acc_rows, 128) f32
        sse_acc = refs[n_lik + 5]      # VMEM (acc_rows, 128) f32

        c = pl.program_id(0)                     # core / partial index
        i = pl.program_id(1)                     # step within this core
        blk = c * steps_per_core + i             # global block index
        first_step = jnp.logical_and(c == 0, i == 0)

        @pl.when(i == 0)
        def _():
            log_acc[...] = jnp.zeros_like(log_acc)
            sse_acc[...] = jnp.zeros_like(sse_acc)

        for ref, meta in zip(lik_refs, lik_meta):
            _log_contrib(ref, meta, blk, log_acc, first_step)

        _sse_contrib(a_ref, b_ref, sse_meta, blk, sse_acc, first_step)

        @pl.when(i == pl.num_programs(1) - 1)
        def _():
            log_out[...] = _fold(log_acc[...], _SUBLANES).reshape(
                1, _SUBLANES, _LANES)
            sse_out[...] = _fold(sse_acc[...], _SUBLANES).reshape(
                1, _SUBLANES, _LANES)

    return kernel


def fused_rd_reduce(likelihood_list, x_hat, target):
    """Single Pallas launch: (sum(log(lik)), sum((x_hat - target)^2))."""
    lik_slabs = [_as_slab(l, 1.0) for l in likelihood_list]
    a_slab = _as_slab(x_hat, 0.0)
    b_slab = _as_slab(target, 0.0)
    assert a_slab.shape == b_slab.shape

    lik_rows = [s.shape[0] for s in lik_slabs]
    sse_rows = a_slab.shape[0]
    n_slabs = len(lik_slabs) + 2
    max_rows = max(lik_rows + [sse_rows])

    block_rows = _pick_block_rows(n_slabs, max_rows)
    acc_rows = min(_ACC_ROWS, block_rows)

    lik_meta = [_Slab(r, block_rows) for r in lik_rows]
    sse_meta = _Slab(sse_rows, block_rows)

    n_blocks_max = max([m.n_blocks for m in lik_meta] + [sse_meta.n_blocks])
    core_split = 2 if n_blocks_max > 1 else 1     # use both TCs on v7x
    steps_per_core = pl.cdiv(n_blocks_max, core_split)
    grid = (core_split, steps_per_core)

    def _tiled_map(n_blocks):
        # Steps past this slab's range revisit its last block (no re-fetch).
        return lambda c, i: (jnp.minimum(c * steps_per_core + i,
                                         n_blocks - 1), 0)

    def _spec(meta, rows):
        if meta.tiled:
            return pl.BlockSpec((block_rows, _LANES), _tiled_map(meta.n_blocks))
        return pl.BlockSpec((rows, _LANES), lambda c, i: (0, 0))

    in_specs = ([_spec(m, r) for m, r in zip(lik_meta, lik_rows)]
                + [_spec(sse_meta, sse_rows), _spec(sse_meta, sse_rows)])
    out_specs = [pl.BlockSpec((1, _SUBLANES, _LANES), lambda c, i: (c, 0, 0)),
                 pl.BlockSpec((1, _SUBLANES, _LANES), lambda c, i: (c, 0, 0))]

    kernel = _make_kernel(lik_meta, sse_meta, block_rows, acc_rows,
                          steps_per_core)

    log_part, sse_part = pl.pallas_call(
        kernel,
        out_shape=(jax.ShapeDtypeStruct((core_split, _SUBLANES, _LANES),
                                        jnp.float32),
                   jax.ShapeDtypeStruct((core_split, _SUBLANES, _LANES),
                                        jnp.float32)),
        grid_spec=pltpu.PrefetchScalarGridSpec(
            num_scalar_prefetch=0,
            grid=grid,
            in_specs=in_specs,
            out_specs=out_specs,
            scratch_shapes=[pltpu.VMEM((acc_rows, _LANES), jnp.float32),
                            pltpu.VMEM((acc_rows, _LANES), jnp.float32)]),
        compiler_params=pltpu.CompilerParams(
            dimension_semantics=("parallel", "arbitrary"),
            vmem_limit_bytes=_VMEM_LIMIT),
    )(*lik_slabs, a_slab, b_slab)

    # Tiny wrapper-side reduction over the per-core (8, 128) partial tiles.
    return jnp.sum(log_part), jnp.sum(sse_part)


# ------------------------------ loss wrapper ------------------------------- #

def rate_distortion_loss(output, target, height, width, lmbda=0.01):
    """JAX/Pallas port of RateDistortionLoss.forward.

    output: dict with
        'x_hat':       f32 NCHW tensor, same shape as target
        'likelihoods': dict of strictly-positive tensors
    target: f32 NCHW tensor (N, C, H, W)
    height, width: Python ints (decoded image dims used for bpp normalization)
    """
    N, _, H, W = target.shape
    num_pixels = N * height * width
    num_pixels_feature = N * H * W     # only used for the (printed) bpp_temp

    likelihood_list = list(output['likelihoods'].values())
    log_sum, sse = fused_rd_reduce(likelihood_list, output['x_hat'], target)

    out = {}
    out['bpp_loss'] = log_sum / (-math.log(2) * num_pixels)
    bpp_temp = log_sum / (-math.log(2) * num_pixels_feature)

    n_elems = math.prod(target.shape)
    out['mse_loss'] = sse / jnp.float32(n_elems)   # nn.MSELoss default 'mean'
    out['loss'] = lmbda * (255.0 ** 2) * out['mse_loss'] + out['bpp_loss']
    # TODO(synk): the module's host-side print() diagnostics are omitted.
    return out, bpp_temp


# --------------------------------- main ------------------------------------ #

if __name__ == "__main__":
    key = jax.random.PRNGKey(0)
    k1, k2, k3, k4 = jax.random.split(key, 4)

    # Small shapes consistent with the module's use:
    #   target / x_hat : NCHW feature tensor (2, 4, 16, 16)
    #   likelihoods    : two entropy-model tensors ('y', 'z'), values in (0, 1]
    target = jax.random.normal(k1, (2, 4, 16, 16), dtype=jnp.float32)
    x_hat = target + 0.05 * jax.random.normal(k2, (2, 4, 16, 16),
                                              dtype=jnp.float32)
    lik_y = jax.random.uniform(k3, (2, 8, 8, 8), dtype=jnp.float32,
                               minval=0.05, maxval=1.0)
    lik_z = jax.random.uniform(k4, (2, 8, 4, 4), dtype=jnp.float32,
                               minval=0.05, maxval=1.0)

    output = {'x_hat': x_hat, 'likelihoods': {'y': lik_y, 'z': lik_z}}
    height, width = 64, 64   # decoded image dims passed into forward()
    lmbda = 0.01

    out, bpp_temp = rate_distortion_loss(output, target, height, width, lmbda)
    jax.block_until_ready(out['loss'])

    # Pure-JAX reference check.
    num_pixels = target.shape[0] * height * width
    ref_bpp = sum(jnp.sum(jnp.log(l)) / (-math.log(2) * num_pixels)
                  for l in output['likelihoods'].values())
    ref_mse = jnp.mean((x_hat - target) ** 2)
    ref_loss = lmbda * 255.0 ** 2 * ref_mse + ref_bpp

    assert jnp.allclose(out['bpp_loss'], ref_bpp, rtol=1e-5, atol=1e-6)
    assert jnp.allclose(out['mse_loss'], ref_mse, rtol=1e-5, atol=1e-7)
    assert jnp.allclose(out['loss'], ref_loss, rtol=1e-5, atol=1e-6)

    print("KERNEL_OK")
</pallas_src>

<mosaic_0001>
module attributes {stable_mosaic.version = 11 : i64} {
  func.func @kernel(%arg0: i32, %arg1: i32, %arg2: memref<8x128xf32, #tpu.memory_space<vmem>>, %arg3: memref<8x128xf32, #tpu.memory_space<vmem>>, %arg4: memref<16x128xf32, #tpu.memory_space<vmem>>, %arg5: memref<16x128xf32, #tpu.memory_space<vmem>>, %arg6: memref<1x8x128xf32, #tpu.memory_space<vmem>>, %arg7: memref<1x8x128xf32, #tpu.memory_space<vmem>>, %arg8: memref<16x128xf32, #tpu.memory_space<vmem>>, %arg9: memref<16x128xf32, #tpu.memory_space<vmem>>) attributes {dimension_semantics = [#tpu.dimension_semantics<parallel>, #tpu.dimension_semantics<arbitrary>], iteration_bounds = array<i64: 1, 1>, scalar_prefetch = 0 : i64, scratch_operands = 2 : i64, tpu.core_type = #tpu.core_type<tc>, window_params = [{pipeline_mode = #tpu.pipeline_mode<synchronous>, transform_indices = @transform_0, window_bounds = array<i64: 8, 128>}, {pipeline_mode = #tpu.pipeline_mode<synchronous>, transform_indices = @transform_1, window_bounds = array<i64: 8, 128>}, {pipeline_mode = #tpu.pipeline_mode<synchronous>, transform_indices = @transform_2, window_bounds = array<i64: 16, 128>}, {pipeline_mode = #tpu.pipeline_mode<synchronous>, transform_indices = @transform_3, window_bounds = array<i64: 16, 128>}, {transform_indices = @transform_4, window_bounds = array<i64: 1, 8, 128>}, {transform_indices = @transform_5, window_bounds = array<i64: 1, 8, 128>}]} {
    %c0_i32 = arith.constant 0 : i32
    %0 = arith.cmpi eq, %arg0, %c0_i32 : i32
    %c0_i32_0 = arith.constant 0 : i32
    %1 = arith.cmpi eq, %arg1, %c0_i32_0 : i32
    %2 = arith.andi %0, %1 : i1
    %c0_i32_1 = arith.constant 0 : i32
    %3 = arith.cmpi eq, %arg1, %c0_i32_1 : i32
    %4 = arith.extui %3 : i1 to i32
    %c0_i32_2 = arith.constant 0 : i32
    %5 = arith.cmpi ne, %4, %c0_i32_2 : i32
    scf.if %5 {
      %cst = arith.constant 0.000000e+00 : f32
      %15 = vector.broadcast %cst : f32 to vector<16x128xf32>
      %c0 = arith.constant 0 : index
      %c0_8 = arith.constant 0 : index
      %16 = vector.load %arg8[%c0, %c0_8] : memref<16x128xf32, #tpu.memory_space<vmem>>, vector<16x128xf32>
      tpu.vector_store %arg8[%c0, %c0_8], %15 {strides = array<i32>} : memref<16x128xf32, #tpu.memory_space<vmem>>, vector<16x128xf32>,
      %cst_9 = arith.constant 0.000000e+00 : f32
      %17 = vector.broadcast %cst_9 : f32 to vector<16x128xf32>
      %c0_10 = arith.constant 0 : index
      %c0_11 = arith.constant 0 : index
      %18 = vector.load %arg9[%c0_10, %c0_11] : memref<16x128xf32, #tpu.memory_space<vmem>>, vector<16x128xf32>
      tpu.vector_store %arg9[%c0_10, %c0_11], %17 {strides = array<i32>} : memref<16x128xf32, #tpu.memory_space<vmem>>, vector<16x128xf32>,
    } else {
    }
    %6 = arith.extui %2 : i1 to i32
    %c0_i32_3 = arith.constant 0 : i32
    %7 = arith.cmpi ne, %6, %c0_i32_3 : i32
    scf.if %7 {
      %c0 = arith.constant 0 : index
      %c0_8 = arith.constant 0 : index
      %15 = vector.load %arg2[%c0, %c0_8] : memref<8x128xf32, #tpu.memory_space<vmem>>, vector<8x128xf32>
      %16 = math.log %15 : vector<8x128xf32>
      %c0_9 = arith.constant 0 : index
      %c0_10 = arith.constant 0 : index
      %17 = vector.load %arg8[%c0_9, %c0_10] : memref<16x128xf32, #tpu.memory_space<vmem>>, vector<8x128xf32>
      %18 = arith.addf %17, %16 : vector<8x128xf32>
      %c0_11 = arith.constant 0 : index
      %c0_12 = arith.constant 0 : index
      %19 = vector.load %arg8[%c0_11, %c0_12] : memref<16x128xf32, #tpu.memory_space<vmem>>, vector<8x128xf32>
      tpu.vector_store %arg8[%c0_11, %c0_12], %18 {strides = array<i32>} : memref<16x128xf32, #tpu.memory_space<vmem>>, vector<8x128xf32>,
    } else {
    }
    %8 = arith.extui %2 : i1 to i32
    %c0_i32_4 = arith.constant 0 : i32
    %9 = arith.cmpi ne, %8, %c0_i32_4 : i32
    scf.if %9 {
      %c0 = arith.constant 0 : index
      %c0_8 = arith.constant 0 : index
      %15 = vector.load %arg3[%c0, %c0_8] : memref<8x128xf32, #tpu.memory_space<vmem>>, vector<8x128xf32>
      %16 = math.log %15 : vector<8x128xf32>
      %c0_9 = arith.constant 0 : index
      %c0_10 = arith.constant 0 : index
      %17 = vector.load %arg8[%c0_9, %c0_10] : memref<16x128xf32, #tpu.memory_space<vmem>>, vector<8x128xf32>
      %18 = arith.addf %17, %16 : vector<8x128xf32>
      %c0_11 = arith.constant 0 : index
      %c0_12 = arith.constant 0 : index
      %19 = vector.load %arg8[%c0_11, %c0_12] : memref<16x128xf32, #tpu.memory_space<vmem>>, vector<8x128xf32>
      tpu.vector_store %arg8[%c0_11, %c0_12], %18 {strides = array<i32>} : memref<16x128xf32, #tpu.memory_space<vmem>>, vector<8x128xf32>,
    } else {
    }
    %10 = arith.extui %2 : i1 to i32
    %c0_i32_5 = arith.constant 0 : i32
    %11 = arith.cmpi ne, %10, %c0_i32_5 : i32
    scf.if %11 {
      %c0 = arith.constant 0 : index
      %c0_8 = arith.constant 0 : index
      %15 = vector.load %arg4[%c0, %c0_8] : memref<16x128xf32, #tpu.memory_space<vmem>>, vector<16x128xf32>
      %c0_9 = arith.constant 0 : index
      %c0_10 = arith.constant 0 : index
      %16 = vector.load %arg5[%c0_9, %c0_10] : memref<16x128xf32, #tpu.memory_space<vmem>>, vector<16x128xf32>
      %17 = arith.subf %15, %16 : vector<16x128xf32>
      %c0_11 = arith.constant 0 : index
      %c0_12 = arith.constant 0 : index
      %18 = vector.load %arg9[%c0_11, %c0_12] : memref<16x128xf32, #tpu.memory_space<vmem>>, vector<8x128xf32>
      %19 = arith.mulf %17, %17 : vector<16x128xf32>
      %20 = vector.shape_cast %19 : vector<16x128xf32> to vector<2x8x128xf32>
      %cst = arith.constant dense<0.000000e+00> : vector<8x128xf32>
      %21 = vector.multi_reduction <add>, %20, %cst [0] : vector<2x8x128xf32> to vector<8x128xf32>
      %22 = arith.addf %18, %21 : vector<8x128xf32>
      %c0_13 = arith.constant 0 : index
      %c0_14 = arith.constant 0 : index
      %23 = vector.load %arg9[%c0_13, %c0_14] : memref<16x128xf32, #tpu.memory_space<vmem>>, vector<8x128xf32>
      tpu.vector_store %arg9[%c0_13, %c0_14], %22 {strides = array<i32>} : memref<16x128xf32, #tpu.memory_space<vmem>>, vector<8x128xf32>,
    } else {
    }
    %c0_i32_6 = arith.constant 0 : i32
    %12 = arith.cmpi eq, %arg1, %c0_i32_6 : i32
    %13 = arith.extui %12 : i1 to i32
    %c0_i32_7 = arith.constant 0 : i32
    %14 = arith.cmpi ne, %13, %c0_i32_7 : i32
    scf.if %14 {
      %c0 = arith.constant 0 : index
      %c0_8 = arith.constant 0 : index
      %15 = vector.load %arg8[%c0, %c0_8] : memref<16x128xf32, #tpu.memory_space<vmem>>, vector<16x128xf32>
      %16 = vector.shape_cast %15 : vector<16x128xf32> to vector<2x8x128xf32>
      %cst = arith.constant dense<0.000000e+00> : vector<8x128xf32>
      %17 = vector.multi_reduction <add>, %16, %cst [0] : vector<2x8x128xf32> to vector<8x128xf32>
      %18 = vector.shape_cast %17 : vector<8x128xf32> to vector<1x8x128xf32>
      %c0_9 = arith.constant 0 : index
      %c0_10 = arith.constant 0 : index
      %c0_11 = arith.constant 0 : index
      %19 = vector.load %arg6[%c0_9, %c0_10, %c0_11] : memref<1x8x128xf32, #tpu.memory_space<vmem>>, vector<1x8x128xf32>
      tpu.vector_store %arg6[%c0_9, %c0_10, %c0_11], %18 {strides = array<i32>} : memref<1x8x128xf32, #tpu.memory_space<vmem>>, vector<1x8x128xf32>,
      %c0_12 = arith.constant 0 : index
      %c0_13 = arith.constant 0 : index
      %20 = vector.load %arg9[%c0_12, %c0_13] : memref<16x128xf32, #tpu.memory_space<vmem>>, vector<16x128xf32>
      %21 = vector.shape_cast %20 : vector<16x128xf32> to vector<2x8x128xf32>
      %cst_14 = arith.constant dense<0.000000e+00> : vector<8x128xf32>
      %22 = vector.multi_reduction <add>, %21, %cst_14 [0] : vector<2x8x128xf32> to vector<8x128xf32>
      %23 = vector.shape_cast %22 : vector<8x128xf32> to vector<1x8x128xf32>
      %c0_15 = arith.constant 0 : index
      %c0_16 = arith.constant 0 : index
      %c0_17 = arith.constant 0 : index
      %24 = vector.load %arg7[%c0_15, %c0_16, %c0_17] : memref<1x8x128xf32, #tpu.memory_space<vmem>>, vector<1x8x128xf32>
      tpu.vector_store %arg7[%c0_15, %c0_16, %c0_17], %23 {strides = array<i32>} : memref<1x8x128xf32, #tpu.memory_space<vmem>>, vector<1x8x128xf32>,
    } else {
    }
    return
  }
  func.func @transform_0(%arg0: i32, %arg1: i32) -> (i32, i32) {
    %c0_i32 = arith.constant 0 : i32
    %c0_i32_0 = arith.constant 0 : i32
    %c0_i32_1 = arith.constant 0 : i32
    return %c0_i32, %c0_i32_0 : i32, i32
  }
  func.func @transform_1(%arg0: i32, %arg1: i32) -> (i32, i32) {
    %c0_i32 = arith.constant 0 : i32
    %c0_i32_0 = arith.constant 0 : i32
    %c0_i32_1 = arith.constant 0 : i32
    return %c0_i32, %c0_i32_0 : i32, i32
  }
  func.func @transform_2(%arg0: i32, %arg1: i32) -> (i32, i32) {
    %c0_i32 = arith.constant 0 : i32
    %c0_i32_0 = arith.constant 0 : i32
    %c0_i32_1 = arith.constant 0 : i32
    return %c0_i32, %c0_i32_0 : i32, i32
  }
  func.func @transform_3(%arg0: i32, %arg1: i32) -> (i32, i32) {
    %c0_i32 = arith.constant 0 : i32
    %c0_i32_0 = arith.constant 0 : i32
    %c0_i32_1 = arith.constant 0 : i32
    return %c0_i32, %c0_i32_0 : i32, i32
  }
  func.func @transform_4(%arg0: i32, %arg1: i32) -> (i32, i32, i32) {
    %c0_i32 = arith.constant 0 : i32
    %c0_i32_0 = arith.constant 0 : i32
    %c0_i32_1 = arith.constant 0 : i32
    return %arg0, %c0_i32, %c0_i32_0 : i32, i32, i32
  }
  func.func @transform_5(%arg0: i32, %arg1: i32) -> (i32, i32, i32) {
    %c0_i32 = arith.constant 0 : i32
    %c0_i32_0 = arith.constant 0 : i32
    %c0_i32_1 = arith.constant 0 : i32
    return %arg0, %c0_i32, %c0_i32_0 : i32, i32, i32
  }
}

</mosaic_0001>

<bundles_post_ra>
// kernel: tpu_custom_call.1
= control target key start
LH: loop header
LB: loop body
LE: loop exit
PB: predicated region body
PF: predicated region fallthrough
CT: control target
= control target key end

     0   :  { %11 = vsyncpa [#allocation5], 0  ;;  %s349_s0 = inlined_call_operand.hbm [shape: f32[8,128], index: 0, kind: input, shape index: {}]   ;;  %s350_s1 = inlined_call_operand.hbm [shape: f32[8,128], index: 1, kind: input, shape index: {}]   ;;  %s351_s2 = inlined_call_operand.hbm [shape: f32[16,128], index: 2, kind: input, shape index: {}]   ;;  %s352_s3 = inlined_call_operand.hbm [shape: f32[16,128], index: 3, kind: input, shape index: {}]   ;;  %s353_s4 = inlined_call_operand.hbm [shape: f32[1,8,128], index: 4, kind: output, shape index: {0}]   ;;  %s354_s5 = inlined_call_operand.hbm [shape: f32[1,8,128], index: 5, kind: output, shape index: {1}]  }
   0x1   :  { %12 = vsyncpa [#allocation8], 0 }
   0x2   :  { %13 = vsyncpa [#allocation11], 0 }
   0x3   :  { %14 = vsyncpa [#allocation6], 0 }
   0x4   :  { %15 = vsyncpa [#allocation14], 0  ;;  %s293_s18 = smov [#allocation7]   ;;  %s294_s20 = smov [#allocation4]  }
   0x5   :  { %s32_s19 = sshll.u32 %s293_s18, 4  ;;  %s22_s21 = sshll.u32 %s294_s20, 4  ;;  %s33_s19 = int_to_ptr.vmem [resolvable:$true] %s32_s19  ;;  %s23_s21 = int_to_ptr.vmem [resolvable:$true] %s22_s21 }
   0x6   :  { %s171_s22 = scalar_lea.vmem %s33_s19, 128  ;;  %p176_p1 = scmp.lt.s32.totalorder %s33_s19, %s33_s19 }
   0x7   :  { %p172_p0 = scmp.ne.s32.totalorder %s33_s19, %s171_s22  ;;  %p177_p2 = scmp.lt.s32.totalorder %s171_s22, %s171_s22 }
   0x9   :  { %p178_p3 = por %p177_p2, %p176_p1 }
   0xb   :  { %p179_p4 = pnand %p178_p3, %p172_p0 }
   0xd   :  { %182 = shalt.err (!%p179_p4)
}
   0xe   :  { %35 = dma.hbm_to_vmem [thread:$0]  %s350_s1, 128, %s33_s19, [#allocation8]  }
   0xf   :  { %s191_s25 = scalar_lea.vmem %s23_s21, 128  ;;  %p196_p6 = scmp.lt.s32.totalorder %s23_s21, %s23_s21 }
  0x10   :  { %p192_p5 = scmp.ne.s32.totalorder %s23_s21, %s191_s25  ;;  %p197_p7 = scmp.lt.s32.totalorder %s191_s25, %s191_s25 }
  0x12   :  { %p198_p8 = por %p197_p7, %p196_p6 }
  0x14   :  { %p199_p9 = pnand %p198_p8, %p192_p5 }
  0x16   :  { %202 = shalt.err (!%p199_p9)
}
  0x17   :  { %25 = dma.hbm_to_vmem [thread:$0]  %s349_s0, 128, %s23_s21, [#allocation5]  }
  0x18   :  { %s295_s28 = smov [#allocation9]  }
  0x19   :  { %s41_s29 = sshll.u32 %s295_s28, 4  ;;  %s42_s29 = int_to_ptr.vmem [resolvable:$true] %s41_s29 }
  0x1a   :  { %s211_s30 = scalar_lea.vmem %s42_s29, 256  ;;  %p216_p11 = scmp.lt.s32.totalorder %s42_s29, %s42_s29 }
  0x1b   :  { %p212_p10 = scmp.ne.s32.totalorder %s42_s29, %s211_s30  ;;  %p217_p12 = scmp.lt.s32.totalorder %s211_s30, %s211_s30 }
  0x1d   :  { %p218_p13 = por %p217_p12, %p216_p11 }
  0x1f   :  { %p219_p0 = pnand %p218_p13, %p212_p10 }
  0x21   :  { %222 = shalt.err (!%p219_p0)
}
  0x22   :  { %s296_s1 = smov 128   ;;  %s297_s6 = smov 8  }
  0x23   :  { %47 = dma.hbm_to_vmem [thread:$0]  %s351_s2, 256, %s42_s29, [#allocation8], %s296_s1, %s296_s1, %s297_s6  }
  0x24   :  { %s298_s9 = smov [#allocation10]  }
  0x25   :  { %s53_s10 = sshll.u32 %s298_s9, 4  ;;  %s54_s10 = int_to_ptr.vmem [resolvable:$true] %s53_s10 }
  0x26   :  { %s231_s0 = scalar_lea.vmem %s54_s10, 256  ;;  %p236_p2 = scmp.lt.s32.totalorder %s54_s10, %s54_s10 }
  0x27   :  { %p232_p1 = scmp.ne.s32.totalorder %s54_s10, %s231_s0  ;;  %p237_p3 = scmp.lt.s32.totalorder %s231_s0, %s231_s0 }
  0x29   :  { %p238_p4 = por %p237_p3, %p236_p2 }
  0x2b   :  { %p239_p5 = pnand %p238_p4, %p232_p1 }
  0x2d   :  { %242 = shalt.err (!%p239_p5)
}
  0x2e   :  { %59 = dma.hbm_to_vmem [thread:$0]  %s352_s3, 256, %s54_s10, [#allocation11], %s296_s1, %s296_s1, %s297_s6  }
  0x2f   :  { %283 = dma.done.wait [#allocation5], 128  }
  0x30   :  { %284 = vsyncadd [#allocation5], 4294967168 }
  0x31   :  { %285 = dma.done.wait [#allocation8], 384  }
  0x32   :  { %286 = vsyncadd [#allocation8], 4294966912 }
  0x33   :  { %287 = dma.done.wait [#allocation11], 256  }
  0x34   :  { %288 = vsyncadd [#allocation11], 4294967040  ;;  %v85_v0 = vld [vmem:[#allocation4] sm:$0xff]  ;;  %v91_v1 = vld [vmem:[#allocation7] sm:$0xff]  ;;  %s299_s2 = smov [#allocation13]  }
  0x35   :  { %v97_v2 = vld [vmem:[#allocation9] sm:$0xff]  ;;  %159 = vlog2.f32 %v85_v0  ;;  %v98_v3 = vld [vmem:[#allocation9 + $0x8] sm:$0xff]  ;;  %v99_v4 = vld [vmem:[#allocation10] sm:$0xff]  ;;  %s136_s13 = sshll.u32 %s299_s2, 4  ;;  %s137_s13 = int_to_ptr.vmem [resolvable:$true] %s136_s13 }
  0x36   :  { %v100_v5 = vld [vmem:[#allocation10 + $0x8] sm:$0xff]  ;;  %161 = vlog2.f32 %v91_v1  ;;  %v101_v6 = vsub.f32 %v97_v2, %v99_v4  ;;  %s243_s3 = scalar_lea.vmem %s137_s13, 128  ;;  %p248_p7 = scmp.lt.s32.totalorder %s137_s13, %s137_s13 }
  0x37   :  { %v102_v7 = vsub.f32 %v98_v3, %v100_v5  ;;  %p244_p6 = scmp.ne.s32.totalorder %s137_s13, %s243_s3  ;;  %p249_p8 = scmp.lt.s32.totalorder %s243_s3, %s243_s3 }
  0x38   :  { %v104_v8 = vmul.f32 %v101_v6, %v101_v6 }
  0x39   :  { %v105_v9 = vmul.f32 %v102_v7, %v102_v7  ;;  %p250_p9 = por %p249_p8, %p248_p7 }
  0x3b   :  { %v106_v10 = vadd.f32 %v105_v9, %v104_v8  ;;  %p251_p10 = pnand %p250_p9, %p244_p6 }
  0x3d   :  { %119 = vst [vmem:[#allocation13] sm:$0xff] %v106_v10 }
  0x3e   :  { %254 = shalt.err (!%p251_p10)
}
  0x3f   :  { %139 = dma.vmem_to_hbm [thread:$0]  %s137_s13, 128, %s354_s5, [#allocation14]  }
  0x40   :  { %s300_s16 = smov [#allocation12]  }
  0x41   :  { %s126_s17 = sshll.u32 %s300_s16, 4  ;;  %s127_s17 = int_to_ptr.vmem [resolvable:$true] %s126_s17 }
  0x42   :  { %v160_v11 = vpop.eup %159  ;;  %s263_s18 = scalar_lea.vmem %s127_s17, 128  ;;  %p268_p12 = scmp.lt.s32.totalorder %s127_s17, %s127_s17 }
  0x43   :  { %v162_v12 = vpop.eup %161  ;;  %v87_v13 = vmul.f32 0.6931472, %v160_v11  ;;  %p264_p11 = scmp.ne.s32.totalorder %s127_s17, %s263_s18  ;;  %p269_p13 = scmp.lt.s32.totalorder %s263_s18, %s263_s18 }
  0x44   :  { %v93_v14 = vmul.f32 0.6931472, %v162_v12 }
  0x45   :  { %p270_p0 = por %p269_p13, %p268_p12 }
  0x46   :  { %v95_v15 = vadd.f32 %v93_v14, %v87_v13 }
  0x47   :  { %p271_p1 = pnand %p270_p0, %p264_p11 }
  0x48   :  { %115 = vst [vmem:[#allocation12] sm:$0xff] %v95_v15 }
  0x49   :  { %274 = shalt.err (!%p271_p1)
}
  0x4a   :  { %129 = dma.vmem_to_hbm [thread:$0]  %s127_s17, 128, %s353_s4, [#allocation6]  }
  0x4b   :  { %289 = dma.done.wait [#allocation6], 128  }
  0x4c   :  { %290 = vsyncadd [#allocation6], 4294967168 }
  0x4d   :  { %291 = dma.done.wait [#allocation14], 128  }
  0x4e   :  { %292 = vsyncadd [#allocation14], 4294967168 }
  0x4f   :  { %146 = vsyncpa [#allocation5], 1 }
  0x50   :  { %147 = vsyncpa [#allocation8], 1 }
  0x51   :  { %148 = vsyncpa [#allocation11], 1 }
  0x52   :  { %149 = vsyncpa [#allocation6], 1 }
  0x53   :  { %150 = vsyncpa [#allocation14], 1 }

</bundles_post_ra>
